<compile_context>
chip_gen: v5e
topology: v5e:2x2
jax: 0.10.0
libtpu: 0.0.40
codegen_flags: <defaults>
</compile_context>

<pallas_src>
import functools

import jax
import jax.numpy as jnp
from jax.experimental import pallas as pl
from jax.experimental.pallas import tpu as pltpu

LANE = 128
_PAD_BIAS = -1e30  # padded action columns -> exp underflows to exactly 0


def dqn_fcn_kernel(x_ref,
                   w1_ref, b1_ref,
                   w2_ref, b2_ref,
                   w3_ref, b3_ref,
                   wa_ref, ba_ref,
                   out_ref):
    # fc1 + relu  (bf16 operands into the MXU, f32 accumulate / elementwise)
    h = jnp.dot(x_ref[...], w1_ref[...], preferred_element_type=jnp.float32)
    h = jnp.maximum(h + b1_ref[...], 0.0)
    # fc2 + relu
    h = jnp.dot(h.astype(jnp.bfloat16), w2_ref[...],
                preferred_element_type=jnp.float32)
    h = jnp.maximum(h + b2_ref[...], 0.0)
    # fc3 + relu
    h = jnp.dot(h.astype(jnp.bfloat16), w3_ref[...],
                preferred_element_type=jnp.float32)
    h = jnp.maximum(h + b3_ref[...], 0.0)
    # action head + softmax over the (lane-padded) action dimension
    logits = jnp.dot(h.astype(jnp.bfloat16), wa_ref[...],
                     preferred_element_type=jnp.float32)
    logits = logits + ba_ref[...]            # padded cols carry a -1e30 bias
    m = jnp.max(logits, axis=-1, keepdims=True)
    e = jnp.exp(logits - m)                  # padded cols -> exactly 0
    denom = jnp.sum(e, axis=-1, keepdims=True)
    out_ref[...] = (e * pl.reciprocal(denom, approx=True)).astype(out_ref.dtype)


def prepare_params(params):
    """One-time prep: (out,in)->(in,out), bf16 weights, f32 (1,out) biases,
    action head padded to a multiple of 128 output lanes."""
    action_size = params["wa"].shape[0]
    pad_n = max(LANE, pl.cdiv(action_size, LANE) * LANE)

    prepped = {}
    for name in ("1", "2", "3"):
        prepped[f"w{name}"] = params[f"w{name}"].T.astype(jnp.bfloat16)
        prepped[f"b{name}"] = params[f"b{name}"][None, :].astype(jnp.float32)

    wa = params["wa"].T                       # (features[2], action_size)
    ba = params["ba"][None, :]
    pad = pad_n - action_size
    prepped["wa"] = jnp.pad(wa, ((0, 0), (0, pad))).astype(jnp.bfloat16)
    prepped["ba"] = jnp.pad(ba, ((0, 0), (0, pad)),
                            constant_values=_PAD_BIAS).astype(jnp.float32)
    return prepped, action_size, pad_n


def dqn_fcn_forward(x, prepped, action_size, pad_n, *, tile_b=512):
    """x: (B, state_size).  prepped/action_size/pad_n from prepare_params."""
    B, state_size = x.shape

    # Batch tile: multiple of 8 sublanes, capped at tile_b; pad B to whole tiles.
    tb = min(tile_b, max(8, ((B + 7) // 8) * 8))
    bp = pl.cdiv(B, tb) * tb
    if bp != B:
        x = jnp.pad(x, ((0, bp - B), (0, 0)))
    x = x.astype(jnp.bfloat16)   # halves HBM traffic for x; MXU is bf16-native

    args = (x,
            prepped["w1"], prepped["b1"],
            prepped["w2"], prepped["b2"],
            prepped["w3"], prepped["b3"],
            prepped["wa"], prepped["ba"])

    def const_spec(a):
        # full-array block, constant index_map -> resident in VMEM, DMA'd once
        return pl.BlockSpec(a.shape, lambda i: (0, 0))

    out = pl.pallas_call(
        dqn_fcn_kernel,
        out_shape=jax.ShapeDtypeStruct((bp, pad_n), jnp.float32),
        grid=(bp // tb,),
        in_specs=[pl.BlockSpec((tb, state_size), lambda i: (i, 0))]
                 + [const_spec(a) for a in args[1:]],
        out_specs=pl.BlockSpec((tb, pad_n), lambda i: (i, 0)),
        compiler_params=pltpu.CompilerParams(
            dimension_semantics=("parallel",)),
    )(*args)

    return out[:B, :action_size]


def init_params(key, state_size, action_size, features):
    """Deterministic init mimicking nn.Linear's U(-1/sqrt(fan_in), 1/sqrt(fan_in))."""
    dims = [(features[0], state_size),
            (features[1], features[0]),
            (features[2], features[1]),
            (action_size, features[2])]
    names = ["1", "2", "3", "a"]
    params = {}
    for name, (fan_out, fan_in) in zip(names, dims):
        key, kw, kb = jax.random.split(key, 3)
        bound = 1.0 / jnp.sqrt(jnp.float32(fan_in))
        params[f"w{name}"] = jax.random.uniform(
            kw, (fan_out, fan_in), jnp.float32, -bound, bound)
        params[f"b{name}"] = jax.random.uniform(
            kb, (fan_out,), jnp.float32, -bound, bound)
    return params


def _ref_forward(x, prepped, action_size):
    """Pure-JAX reference using the same prepped (bf16) weights."""
    h = x.astype(jnp.bfloat16)
    h = jnp.dot(h, prepped["w1"], preferred_element_type=jnp.float32) + prepped["b1"]
    h = jnp.maximum(h, 0.0)
    h = jnp.dot(h.astype(jnp.bfloat16), prepped["w2"],
                preferred_element_type=jnp.float32) + prepped["b2"]
    h = jnp.maximum(h, 0.0)
    h = jnp.dot(h.astype(jnp.bfloat16), prepped["w3"],
                preferred_element_type=jnp.float32) + prepped["b3"]
    h = jnp.maximum(h, 0.0)
    logits = jnp.dot(h.astype(jnp.bfloat16), prepped["wa"],
                     preferred_element_type=jnp.float32) + prepped["ba"]
    return jax.nn.softmax(logits, axis=-1)[:, :action_size]


if __name__ == "__main__":
    key = jax.random.PRNGKey(0)

    batch = 2
    state_size = 16
    features = (32, 64, 32)
    action_size = 8

    key, k_x, k_p = jax.random.split(key, 3)
    x = jax.random.normal(k_x, (batch, state_size), dtype=jnp.float32)
    params = init_params(k_p, state_size, action_size, features)

    # One-time param preparation (transpose / cast / pad) -- off the hot path.
    prepped, a_sz, pad_n = prepare_params(params)

    fwd = jax.jit(functools.partial(dqn_fcn_forward,
                                    action_size=a_sz, pad_n=pad_n))
    out = jax.block_until_ready(fwd(x, prepped))

    # sanity: shape, probabilities sum to 1 (loose: approx reciprocal + bf16)
    assert out.shape == (batch, action_size)
    assert bool(jnp.all(jnp.abs(jnp.sum(out, axis=-1) - 1.0) < 2e-3))
    # sanity: match a pure-JAX reference using the same bf16 weights
    ref = _ref_forward(x, prepped, a_sz)
    assert bool(jnp.all(jnp.abs(out - ref) < 1e-2))

    print("KERNEL_OK")
</pallas_src>

<mosaic_0001>
module attributes {stable_mosaic.version = 11 : i64} {
  func.func @dqn_fcn_kernel(%arg0: i32, %arg1: memref<8x16xbf16, #tpu.memory_space<vmem>>, %arg2: memref<16x32xbf16, #tpu.memory_space<vmem>>, %arg3: memref<1x32xf32, #tpu.memory_space<vmem>>, %arg4: memref<32x64xbf16, #tpu.memory_space<vmem>>, %arg5: memref<1x64xf32, #tpu.memory_space<vmem>>, %arg6: memref<64x32xbf16, #tpu.memory_space<vmem>>, %arg7: memref<1x32xf32, #tpu.memory_space<vmem>>, %arg8: memref<32x128xbf16, #tpu.memory_space<vmem>>, %arg9: memref<1x128xf32, #tpu.memory_space<vmem>>, %arg10: memref<8x128xf32, #tpu.memory_space<vmem>>) attributes {dimension_semantics = [#tpu.dimension_semantics<parallel>], iteration_bounds = array<i64: 1>, scalar_prefetch = 0 : i64, scratch_operands = 0 : i64, tpu.core_type = #tpu.core_type<tc>, window_params = [{transform_indices = @transform_0, window_bounds = array<i64: 8, 16>}, {pipeline_mode = #tpu.pipeline_mode<synchronous>, transform_indices = @transform_1, window_bounds = array<i64: 16, 32>}, {pipeline_mode = #tpu.pipeline_mode<synchronous>, transform_indices = @transform_2, window_bounds = array<i64: 1, 32>}, {pipeline_mode = #tpu.pipeline_mode<synchronous>, transform_indices = @transform_3, window_bounds = array<i64: 32, 64>}, {pipeline_mode = #tpu.pipeline_mode<synchronous>, transform_indices = @transform_4, window_bounds = array<i64: 1, 64>}, {pipeline_mode = #tpu.pipeline_mode<synchronous>, transform_indices = @transform_5, window_bounds = array<i64: 64, 32>}, {pipeline_mode = #tpu.pipeline_mode<synchronous>, transform_indices = @transform_6, window_bounds = array<i64: 1, 32>}, {pipeline_mode = #tpu.pipeline_mode<synchronous>, transform_indices = @transform_7, window_bounds = array<i64: 32, 128>}, {pipeline_mode = #tpu.pipeline_mode<synchronous>, transform_indices = @transform_8, window_bounds = array<i64: 1, 128>}, {transform_indices = @transform_9, window_bounds = array<i64: 8, 128>}]} {
    %c0 = arith.constant 0 : index
    %c0_0 = arith.constant 0 : index
    %0 = vector.load %arg1[%c0, %c0_0] : memref<8x16xbf16, #tpu.memory_space<vmem>>, vector<8x16xbf16>
    %c0_1 = arith.constant 0 : index
    %c0_2 = arith.constant 0 : index
    %1 = vector.load %arg2[%c0_1, %c0_2] : memref<16x32xbf16, #tpu.memory_space<vmem>>, vector<16x32xbf16>
    %cst = arith.constant dense<0.000000e+00> : vector<8x32xf32>
    %2 = tpu.matmul %0, %1, %cst {dimension_numbers = #tpu.dot_dimension_numbers<[1], [0], [0], [1], [0, 0, 1, 1], [], []>} : vector<8x16xbf16>, vector<16x32xbf16>, vector<8x32xf32> -> vector<8x32xf32>
    %c0_3 = arith.constant 0 : index
    %c0_4 = arith.constant 0 : index
    %3 = vector.load %arg3[%c0_3, %c0_4] : memref<1x32xf32, #tpu.memory_space<vmem>>, vector<1x32xf32>
    %4 = vector.broadcast %3 : vector<1x32xf32> to vector<8x32xf32>
    %5 = arith.addf %2, %4 : vector<8x32xf32>
    %cst_5 = arith.constant 0.000000e+00 : f32
    %6 = vector.broadcast %cst_5 : f32 to vector<8x32xf32>
    %7 = arith.maximumf %5, %6 : vector<8x32xf32>
    %8 = arith.truncf %7 : vector<8x32xf32> to vector<8x32xbf16>
    %c0_6 = arith.constant 0 : index
    %c0_7 = arith.constant 0 : index
    %9 = vector.load %arg4[%c0_6, %c0_7] : memref<32x64xbf16, #tpu.memory_space<vmem>>, vector<32x64xbf16>
    %cst_8 = arith.constant dense<0.000000e+00> : vector<8x64xf32>
    %10 = tpu.matmul %8, %9, %cst_8 {dimension_numbers = #tpu.dot_dimension_numbers<[1], [0], [0], [1], [0, 0, 1, 1], [], []>} : vector<8x32xbf16>, vector<32x64xbf16>, vector<8x64xf32> -> vector<8x64xf32>
    %c0_9 = arith.constant 0 : index
    %c0_10 = arith.constant 0 : index
    %11 = vector.load %arg5[%c0_9, %c0_10] : memref<1x64xf32, #tpu.memory_space<vmem>>, vector<1x64xf32>
    %12 = vector.broadcast %11 : vector<1x64xf32> to vector<8x64xf32>
    %13 = arith.addf %10, %12 : vector<8x64xf32>
    %cst_11 = arith.constant 0.000000e+00 : f32
    %14 = vector.broadcast %cst_11 : f32 to vector<8x64xf32>
    %15 = arith.maximumf %13, %14 : vector<8x64xf32>
    %16 = arith.truncf %15 : vector<8x64xf32> to vector<8x64xbf16>
    %c0_12 = arith.constant 0 : index
    %c0_13 = arith.constant 0 : index
    %17 = vector.load %arg6[%c0_12, %c0_13] : memref<64x32xbf16, #tpu.memory_space<vmem>>, vector<64x32xbf16>
    %cst_14 = arith.constant dense<0.000000e+00> : vector<8x32xf32>
    %18 = tpu.matmul %16, %17, %cst_14 {dimension_numbers = #tpu.dot_dimension_numbers<[1], [0], [0], [1], [0, 0, 1, 1], [], []>} : vector<8x64xbf16>, vector<64x32xbf16>, vector<8x32xf32> -> vector<8x32xf32>
    %c0_15 = arith.constant 0 : index
    %c0_16 = arith.constant 0 : index
    %19 = vector.load %arg7[%c0_15, %c0_16] : memref<1x32xf32, #tpu.memory_space<vmem>>, vector<1x32xf32>
    %20 = vector.broadcast %19 : vector<1x32xf32> to vector<8x32xf32>
    %21 = arith.addf %18, %20 : vector<8x32xf32>
    %cst_17 = arith.constant 0.000000e+00 : f32
    %22 = vector.broadcast %cst_17 : f32 to vector<8x32xf32>
    %23 = arith.maximumf %21, %22 : vector<8x32xf32>
    %24 = arith.truncf %23 : vector<8x32xf32> to vector<8x32xbf16>
    %c0_18 = arith.constant 0 : index
    %c0_19 = arith.constant 0 : index
    %25 = vector.load %arg8[%c0_18, %c0_19] : memref<32x128xbf16, #tpu.memory_space<vmem>>, vector<32x128xbf16>
    %cst_20 = arith.constant dense<0.000000e+00> : vector<8x128xf32>
    %26 = tpu.matmul %24, %25, %cst_20 {dimension_numbers = #tpu.dot_dimension_numbers<[1], [0], [0], [1], [0, 0, 1, 1], [], []>} : vector<8x32xbf16>, vector<32x128xbf16>, vector<8x128xf32> -> vector<8x128xf32>
    %c0_21 = arith.constant 0 : index
    %c0_22 = arith.constant 0 : index
    %27 = vector.load %arg9[%c0_21, %c0_22] : memref<1x128xf32, #tpu.memory_space<vmem>>, vector<1x128xf32>
    %28 = vector.broadcast %27 : vector<1x128xf32> to vector<8x128xf32>
    %29 = arith.addf %26, %28 : vector<8x128xf32>
    %cst_23 = arith.constant dense<0xFF800000> : vector<8xf32>
    %30 = vector.multi_reduction <maximumf>, %29, %cst_23 [1] : vector<8x128xf32> to vector<8xf32>
    %31 = vector.shape_cast %30 : vector<8xf32> to vector<8x1xf32>
    %32 = vector.broadcast %31 : vector<8x1xf32> to vector<8x128xf32>
    %33 = arith.subf %29, %32 : vector<8x128xf32>
    %34 = math.exp %33 : vector<8x128xf32>
    %cst_24 = arith.constant dense<0.000000e+00> : vector<8xf32>
    %35 = vector.multi_reduction <add>, %34, %cst_24 [1] : vector<8x128xf32> to vector<8xf32>
    %36 = vector.shape_cast %35 : vector<8xf32> to vector<8x1xf32>
    %37 = tpu.reciprocal %36 {approx = true} : vector<8x1xf32> -> vector<8x1xf32>
    %38 = vector.broadcast %37 : vector<8x1xf32> to vector<8x128xf32>
    %39 = arith.mulf %34, %38 : vector<8x128xf32>
    %c0_25 = arith.constant 0 : index
    %c0_26 = arith.constant 0 : index
    %40 = vector.load %arg10[%c0_25, %c0_26] : memref<8x128xf32, #tpu.memory_space<vmem>>, vector<8x128xf32>
    tpu.vector_store %arg10[%c0_25, %c0_26], %39 {strides = array<i32>} : memref<8x128xf32, #tpu.memory_space<vmem>>, vector<8x128xf32>,
    return
  }
  func.func @transform_0(%arg0: i32) -> (i32, i32) {
    %c0_i32 = arith.constant 0 : i32
    %c0_i32_0 = arith.constant 0 : i32
    return %arg0, %c0_i32 : i32, i32
  }
  func.func @transform_1(%arg0: i32) -> (i32, i32) {
    %c0_i32 = arith.constant 0 : i32
    %c0_i32_0 = arith.constant 0 : i32
    %c0_i32_1 = arith.constant 0 : i32
    return %c0_i32, %c0_i32_0 : i32, i32
  }
  func.func @transform_2(%arg0: i32) -> (i32, i32) {
    %c0_i32 = arith.constant 0 : i32
    %c0_i32_0 = arith.constant 0 : i32
    %c0_i32_1 = arith.constant 0 : i32
    return %c0_i32, %c0_i32_0 : i32, i32
  }
  func.func @transform_3(%arg0: i32) -> (i32, i32) {
    %c0_i32 = arith.constant 0 : i32
    %c0_i32_0 = arith.constant 0 : i32
    %c0_i32_1 = arith.constant 0 : i32
    return %c0_i32, %c0_i32_0 : i32, i32
  }
  func.func @transform_4(%arg0: i32) -> (i32, i32) {
    %c0_i32 = arith.constant 0 : i32
    %c0_i32_0 = arith.constant 0 : i32
    %c0_i32_1 = arith.constant 0 : i32
    return %c0_i32, %c0_i32_0 : i32, i32
  }
  func.func @transform_5(%arg0: i32) -> (i32, i32) {
    %c0_i32 = arith.constant 0 : i32
    %c0_i32_0 = arith.constant 0 : i32
    %c0_i32_1 = arith.constant 0 : i32
    return %c0_i32, %c0_i32_0 : i32, i32
  }
  func.func @transform_6(%arg0: i32) -> (i32, i32) {
    %c0_i32 = arith.constant 0 : i32
    %c0_i32_0 = arith.constant 0 : i32
    %c0_i32_1 = arith.constant 0 : i32
    return %c0_i32, %c0_i32_0 : i32, i32
  }
  func.func @transform_7(%arg0: i32) -> (i32, i32) {
    %c0_i32 = arith.constant 0 : i32
    %c0_i32_0 = arith.constant 0 : i32
    %c0_i32_1 = arith.constant 0 : i32
    return %c0_i32, %c0_i32_0 : i32, i32
  }
  func.func @transform_8(%arg0: i32) -> (i32, i32) {
    %c0_i32 = arith.constant 0 : i32
    %c0_i32_0 = arith.constant 0 : i32
    %c0_i32_1 = arith.constant 0 : i32
    return %c0_i32, %c0_i32_0 : i32, i32
  }
  func.func @transform_9(%arg0: i32) -> (i32, i32) {
    %c0_i32 = arith.constant 0 : i32
    %c0_i32_0 = arith.constant 0 : i32
    return %arg0, %c0_i32 : i32, i32
  }
}

</mosaic_0001>

<bundles_post_ra>
// kernel: dqn_fcn_forward.1
= control target key start
LH: loop header
LB: loop body
LE: loop exit
PB: predicated region body
PF: predicated region fallthrough
CT: control target
= control target key end

     0   :  { %vm46_vm0 = vcmask 130048   ;;  %vm85_vm1 = vcmask 261120   ;;  %vm140_vm2 = vcmask 523264   ;;  %s363_s1 = inlined_call_operand.vmem [shape: bf16[16,32], index: 1, kind: input, shape index: {}]   ;;  %s364_s0 = inlined_call_operand.vmem [shape: bf16[8,16], index: 0, kind: input, shape index: {}]   ;;  %s365_s2 = inlined_call_operand.vmem [shape: f32[1,32], index: 2, kind: input, shape index: {}]   ;;  %s366_s4 = inlined_call_operand.vmem [shape: f32[1,64], index: 4, kind: input, shape index: {}]   ;;  %s367_s3 = inlined_call_operand.vmem [shape: bf16[32,64], index: 3, kind: input, shape index: {}]   ;;  %s368_s5 = inlined_call_operand.vmem [shape: bf16[64,32], index: 5, kind: input, shape index: {}]   ;;  %s369_s6 = inlined_call_operand.vmem [shape: f32[1,32], index: 6, kind: input, shape index: {}]   ;;  %s370_s8 = inlined_call_operand.vmem [shape: f32[1,128], index: 8, kind: input, shape index: {}]   ;;  %s371_s7 = inlined_call_operand.vmem [shape: bf16[32,128], index: 7, kind: input, shape index: {}]   ;;  %s372_s9 = inlined_call_operand.vmem [shape: f32[8,128], index: 9, kind: output, shape index: {}]  }
   0x1   :  { %v249_v0 = vld [vmem:[%s363_s1] sm:$0xff]  ;;  %v251_v2 = vld [vmem:[%s367_s3 + $0x8] sm:$0xff]  ;;  %v255_v4 = vld [vmem:[%s368_s5 + $0x18] sm:$0xff] }
   0x2   :  { %57 = vmatpush.bf16.msra.mxu0 %v249_v0  ;;  %v33_v1 = vld [vmem:[%s364_s0] sm:$0xf]  ;;  %95 = vmatpush.bf16.msra.mxu1 %v251_v2  ;;  %v254_v5 = vld [vmem:[%s368_s5 + $0x10] sm:$0xff]  ;;  %v253_v12 = vld [vmem:[%s368_s5 + $0x8] sm:$0xff] }
   0x3   :  { %v250_v3 = vld [vmem:[%s367_s3] sm:$0xff]  ;;  %148 = vmatpush.bf16.msra.mxu2 %v255_v4  ;;  %v257_v20 = vld [vmem:[%s371_s7 + $0x8] sm:$0xff] }
   0x4   :  { %v258_v6 = vld [vmem:[%s365_s2] ss:$0 sm:$0xff]  ;;  %188 = vmatpush.bf16.msra.mxu3 %v257_v20 }
   0x5   :  { %213 = vmatmul.msk.bf16.vlgmr.msra.gmra.mxu0 %vm46_vm0, %v33_v1  ;;  %v252_v13 = vld [vmem:[%s368_s5] sm:$0xff] }
   0x6   :  { %96 = vmatpush.bf16.msra.mxu1 %v250_v3  ;;  %v259_v14 = vld [vmem:[%s366_s4] ss:$0 sm:$0xff] }
   0x7   :  { %149 = vmatpush.bf16.msra.mxu2 %v254_v5  ;;  %v256_v21 = vld [vmem:[%s371_s7] sm:$0xff] }
   0x8   :  { %189 = vmatpush.bf16.msra.mxu3 %v256_v21  ;;  %v260_v22 = vld [vmem:[%s369_s6] ss:$0 sm:$0xff] }
   0x9   :  { %v261_v28 = vld [vmem:[%s370_s8] ss:$0 sm:$0xff] }
   0xb   :  { %150 = vmatpush.bf16.msra.mxu2 %v253_v12 }
   0xf   :  { %151 = vmatpush.bf16.msra.mxu2 %v252_v13 }
  0x82   :  { %v59_v7 = vpop.f32.mrf.mxu0 }
  0x83   :  { %v60_v8 = vadd.f32 %v258_v6, %v59_v7 }
  0x85   :  { %v63_v9 = vmax.f32 %v60_v8, 0.0 }
  0x87   :  { %v64_v10 = vpack.c.bf16 %v63_v9, %v63_v9 }
  0x89   :  { %222 = vmatmul.msk.bf16.vlgmr.msra.gmra.mxu1 %vm85_vm1, %v64_v10 }
  0x8a   :  { %v61_v11 = vpop.f32.mrf.mxu0 }
 0x106   :  { %v98_v15 = vpop.f32.mrf.mxu1 }
 0x107   :  { %v99_v16 = vadd.f32 %v259_v14, %v98_v15 }
 0x109   :  { %v102_v17 = vmax.f32 %v99_v16, 0.0 }
 0x10b   :  { %v103_v18 = vpack.c.bf16 %v102_v17, %v102_v17 }
 0x10d   :  { %239 = vmatmul.msk.bf16.vlgmr.msra.gmra.mxu2 %vm140_vm2, %v103_v18 }
 0x10e   :  { %v100_v19 = vpop.f32.mrf.mxu1 }
 0x190   :  { %v153_v23 = vpop.f32.mrf.mxu2 }
 0x191   :  { %v154_v24 = vadd.f32 %v260_v22, %v153_v23 }
 0x193   :  { %v157_v25 = vmax.f32 %v154_v24, 0.0 }
 0x195   :  { %v158_v26 = vpack.c.bf16 %v157_v25, %v157_v25 }
 0x197   :  { %248 = vmatmul.msk.bf16.vlgmr.msra.gmra.mxu3 %vm85_vm1, %v158_v26 }
 0x198   :  { %v155_v27 = vpop.f32.mrf.mxu2 }
 0x21a   :  { %v191_v29 = vpop.f32.mrf.mxu3 }
 0x21b   :  { %v192_v30 = vadd.f32 %v261_v28, %v191_v29 }
 0x21d   :  { %195 = vmax.xlane.f32.xlu0 %v192_v30 }
 0x222   :  { %v193_v31 = vpop.f32.mrf.mxu3 }
 0x290   :  { %v196_v32 = vpop.xlane.xlu0 %195 }
 0x291   :  { %v197_v33 = vsub.f32 %v192_v30, %v196_v32 }
 0x293   :  { %v198_v34 = vmul.f32 1.442695, %v197_v33 }
 0x295   :  { %262 = vpow2.f32 %v198_v34 }
 0x29b   :  { %v263_v35 = vpop.eup %262 }
 0x29c   :  { %200 = vadd.xlane.f32.xlu0 %v263_v35 }
 0x30f   :  { %v201_v36 = vpop.xlane.xlu0 %200 }
 0x310   :  { %264 = vrcp.f32 %v201_v36 }
 0x316   :  { %v265_v37 = vpop.eup %264 }
 0x317   :  { %v203_v38 = vmul.f32 %v265_v37, %v263_v35 }
 0x319   :  { %204 = vst [vmem:[%s372_s9] sm:$0xff] %v203_v38 }

</bundles_post_ra>
